<compile_context>
chip_gen: v6e
topology: v6e:2x2x1
jax: 0.10.0
libtpu: 0.0.40
codegen_flags: <defaults>
</compile_context>

<pallas_src>
import functools
import math

import jax
import jax.numpy as jnp
from jax.experimental import pallas as pl
from jax.experimental.pallas import tpu as pltpu

EPS = 1e-12  # torch.nn.functional.normalize eps


# ----------------------------------------------------------------------------
# VMEM-aware tile selection
# ----------------------------------------------------------------------------
def _vlad_vmem_est(bt, n, feat, clust, x_itemsize, out_itemsize):
    rows = bt * n
    b = 2 * rows * feat * x_itemsize            # double-buffered x tile
    b += 2 * bt * clust * feat * out_itemsize   # double-buffered output tile
    b += 2 * rows * feat * 4                    # xn + one x-sized f32 temp
    b += 2 * rows * clust * 4                   # soft-assignment activations
    b += bt * clust * feat * 4                  # f32 vlad before the final cast
    return b


def _vlad_batch_tile(B, n, feat, clust, x_itemsize, out_itemsize,
                     budget=36 * 2**20):
    """Largest batch tile whose working set fits a budget that is safe on
    every generation (v7x: 64 MiB physical VMEM; v5e/v6e: 128 MiB)."""
    for bt in (64, 32, 16, 8, 4, 2, 1):
        if B % bt == 0 and _vlad_vmem_est(bt, n, feat, clust,
                                          x_itemsize, out_itemsize) <= budget:
            return bt
    # TODO(synk): also tile over max_samples if even bt=1 exceeds the budget.
    return 1


def _head_k_tile(K, odim, w_itemsize, budget=24 * 2**20):
    """K tile for the dim-reduction matmul: double-buffered (kt, ODIM) weight
    tile must fit the budget.  Explicit guard instead of a silent OOM."""
    if 2 * K * odim * w_itemsize <= budget:
        return K
    for kt in (4096, 2048, 1024, 512, 256, 128):
        if K % kt == 0 and 2 * kt * odim * w_itemsize <= budget:
            return kt
    raise ValueError(
        f"hidden1_weights contraction dim K={K} has no 128-multiple tile that "
        f"fits the {budget >> 20} MiB VMEM budget; pad K or use a narrower "
        f"weight dtype.")


def _head_vmem_est(bt, kt, odim, act_itemsize, w_itemsize):
    b = 2 * bt * kt * act_itemsize              # double-buffered activation tile
    b += 2 * kt * odim * w_itemsize             # double-buffered hidden1 tile
    b += bt * odim * 4                          # f32 accumulator scratch
    b += 2 * bt * odim * 4                      # double-buffered output tile
    b += 2 * (odim * odim + 2 * odim) * w_itemsize  # gating weight + biases
    return b


def _head_batch_tile(B, kt, odim, act_itemsize, budget=12 * 2**20):
    """Weight-stationary head: the batch tile is as large as the budget allows
    so hidden1_weights is streamed from HBM once (or twice — B//2 is preferred
    when legal so the parallel batch axis keeps 2 steps for v7x's 2 TCs)."""
    def fits(bt):
        b = 2 * bt * kt * act_itemsize + bt * odim * 4 + 2 * bt * odim * 4
        return b <= budget

    prefs = ([B // 2] if B % 16 == 0 else []) + [B]
    for bt in prefs:
        if bt <= 256 and fits(bt):
            return bt
    for bt in range(min(256, (B // 8) * 8), 7, -8):
        if B % bt == 0 and fits(bt):
            return bt
    return B  # tiny batches: a full-B block is always a legal block shape


def _vmem_limit(est_bytes):
    # headroom over the tile estimate, clamped safely below v7x's 64 MiB
    # physical VMEM (v5e/v6e have 128 MiB, so this is always legal there)
    return int(min(max(est_bytes * 3 // 2 + (8 << 20), 16 << 20), 48 << 20))


# ----------------------------------------------------------------------------
# Kernel 1: batched VLAD descriptor (normalize, soft-assign, pool, normalize)
#   output layout is lane-dense [Bt, CLUST, FEAT] (FEAT on lanes).
# ----------------------------------------------------------------------------
def _vlad_kernel(x_ref, cw_ref, cb_ref, out_ref, *, approx):
    # x_ref:   (Bt, N, FEAT)   native input dtype, upcast after DMA
    # cw_ref:  (FEAT, CLUST)
    # cb_ref:  (1, CLUST)
    # out_ref: (Bt, CLUST, FEAT)
    bt, n, feat = x_ref.shape
    clust = cw_ref.shape[1]
    mdt = cw_ref.dtype  # MXU operand dtype (f32 by default, bf16 optional)

    # collapse batch*samples so the assignment matmul is one dense MXU pass
    xb = x_ref[...].astype(jnp.float32).reshape(bt * n, feat)

    # input L2 normalization along the feature dim (F.normalize(x, dim=1));
    # rsqrt(max(ss, eps^2)) == 1/max(||x||, eps), runs on the EUP (no divide).
    # The scale is fused straight into the matmul operand; xb is dead after.
    ss = jnp.sum(xb * xb, axis=1, keepdims=True)
    xn = xb * jax.lax.rsqrt(jnp.maximum(ss, EPS * EPS))

    # soft cluster assignment: matmul + bias + softmax over clusters
    act = jnp.dot(xn.astype(mdt), cw_ref[...], preferred_element_type=jnp.float32)
    act = act + cb_ref[...]
    act = act - jnp.max(act, axis=1, keepdims=True)
    act = jnp.exp(act)
    denom = jnp.sum(act, axis=1, keepdims=True)
    # approx=True rides the otherwise-idle EUP slot (production); the exact
    # path keeps the strict 1e-5 tolerance for the demo check.
    act = act * pl.reciprocal(denom, approx=approx)            # [Bt*N, CLUST]

    # pooling: vlad[b, c, f] = sum_n act[b, n, c] * xn[b, n, f]
    # (transpose implied by the contraction lands on the narrow CLUST operand)
    act3 = act.reshape(bt, n, clust)
    xn3 = xn.reshape(bt, n, feat)
    vlad = jax.lax.dot_general(
        act3.astype(mdt), xn3.astype(mdt),
        dimension_numbers=(((1,), (1,)), ((0,), (0,))),
        preferred_element_type=jnp.float32)                    # [Bt, CLUST, FEAT]

    # intra-normalization: L2 over the feature dim, per (batch, cluster)
    ss_c = jnp.sum(vlad * vlad, axis=2, keepdims=True)
    vlad = vlad * jax.lax.rsqrt(jnp.maximum(ss_c, EPS * EPS))

    # global L2 normalization of the whole flattened descriptor
    ss_g = jnp.sum(jnp.sum(vlad * vlad, axis=2, keepdims=True), axis=1,
                   keepdims=True)
    vlad = vlad * jax.lax.rsqrt(jnp.maximum(ss_g, EPS * EPS))

    out_ref[...] = vlad.astype(out_ref.dtype)


# ----------------------------------------------------------------------------
# Kernel 2: dim reduction (K-tiled, accumulated) + context gating epilogue
# ----------------------------------------------------------------------------
def _head_kernel(v_ref, w_ref, h1b_ref, gw_ref, gb_ref, out_ref, acc_ref):
    # v_ref:   (Bt, Kt)        flattened VLAD tile (c*FEAT + f order)
    # w_ref:   (Kt, ODIM)      permuted hidden1_weights tile
    # h1b_ref: (1, ODIM)       gw_ref: (ODIM, ODIM)    gb_ref: (1, ODIM)
    # out_ref: (Bt, ODIM)      acc_ref: (Bt, ODIM) f32 VMEM scratch
    k = pl.program_id(1)

    @pl.when(k == 0)
    def _init():
        acc_ref[...] = jnp.zeros_like(acc_ref)

    acc_ref[...] += jnp.dot(v_ref[...], w_ref[...],
                            preferred_element_type=jnp.float32)

    @pl.when(k == pl.num_programs(1) - 1)
    def _finalize():
        hid = acc_ref[...] + h1b_ref[...]
        gates = jnp.dot(hid.astype(gw_ref.dtype), gw_ref[...],
                        preferred_element_type=jnp.float32) + gb_ref[...]
        gates = jax.nn.sigmoid(gates)
        out_ref[...] = (hid * gates).astype(out_ref.dtype)


# ----------------------------------------------------------------------------
# Wrapper
# ----------------------------------------------------------------------------
def netrvlad_forward(x, params, *, batch, max_samples, feature_size,
                     cluster_size, output_dim, mxu_dtype=jnp.float32,
                     approx_reciprocal=False):
    B, N, FEAT, CLUST, ODIM = batch, max_samples, feature_size, cluster_size, output_dim
    assert x.shape == (B * N, FEAT)

    # keep x in its native dtype (pass bf16 in production); the kernel upcasts
    # to f32 after the DMA, so no extra HBM copy of x is materialized here.
    x3 = x.reshape(B, N, FEAT)

    cw = params["cluster_weights"].astype(mxu_dtype)
    cb2 = params["cluster_biases"].reshape(1, CLUST).astype(jnp.float32)
    # one-time host permutation of hidden1_weights rows: the kernel flattens
    # the descriptor in c*FEAT+f order (lane-dense), the module uses f*CLUST+c.
    h1w = params["hidden1_weights"].reshape(FEAT, CLUST, ODIM)
    h1w = jnp.transpose(h1w, (1, 0, 2)).reshape(CLUST * FEAT, ODIM)
    h1w = h1w.astype(mxu_dtype)
    h1b2 = params["hidden1_biases"].reshape(1, ODIM).astype(jnp.float32)
    gw = params["gating_weights"].astype(mxu_dtype)
    gb2 = params["gating_biases"].reshape(1, ODIM).astype(jnp.float32)

    x_itemsize = jnp.dtype(x.dtype).itemsize
    mxu_itemsize = jnp.dtype(mxu_dtype).itemsize

    # ---- kernel 1: VLAD descriptor ------------------------------------------
    bt = _vlad_batch_tile(B, N, FEAT, CLUST, x_itemsize, mxu_itemsize)
    vlad_est = _vlad_vmem_est(bt, N, FEAT, CLUST, x_itemsize, mxu_itemsize)

    vlad = pl.pallas_call(
        functools.partial(_vlad_kernel, approx=approx_reciprocal),
        out_shape=jax.ShapeDtypeStruct((B, CLUST, FEAT), mxu_dtype),
        grid=(B // bt,),
        in_specs=[
            pl.BlockSpec((bt, N, FEAT), lambda b: (b, 0, 0)),
            pl.BlockSpec((FEAT, CLUST), lambda b: (0, 0)),
            pl.BlockSpec((1, CLUST), lambda b: (0, 0)),
        ],
        out_specs=pl.BlockSpec((bt, CLUST, FEAT), lambda b: (b, 0, 0)),
        compiler_params=pltpu.CompilerParams(
            dimension_semantics=("parallel",),
            vmem_limit_bytes=_vmem_limit(vlad_est)),
    )(x3, cw, cb2)

    # flatten [B, CLUST, FEAT] -> [B, CLUST*FEAT] (contiguous trailing collapse;
    # layout glue — semantics restored by the h1w row permutation above).
    K = CLUST * FEAT
    flat = vlad.reshape(B, K)

    # ---- kernel 2: weight-stationary dim reduction + gating -----------------
    kt = _head_k_tile(K, ODIM, mxu_itemsize)
    bt_h = _head_batch_tile(B, kt, ODIM, mxu_itemsize)
    head_est = _head_vmem_est(bt_h, kt, ODIM, mxu_itemsize, mxu_itemsize)

    out = pl.pallas_call(
        _head_kernel,
        out_shape=jax.ShapeDtypeStruct((B, ODIM), jnp.float32),
        grid=(B // bt_h, K // kt),
        in_specs=[
            pl.BlockSpec((bt_h, kt), lambda b, k: (b, k)),
            pl.BlockSpec((kt, ODIM), lambda b, k: (k, 0)),
            pl.BlockSpec((1, ODIM), lambda b, k: (0, 0)),
            pl.BlockSpec((ODIM, ODIM), lambda b, k: (0, 0)),
            pl.BlockSpec((1, ODIM), lambda b, k: (0, 0)),
        ],
        out_specs=pl.BlockSpec((bt_h, ODIM), lambda b, k: (b, 0)),
        scratch_shapes=[pltpu.VMEM((bt_h, ODIM), jnp.float32)],
        compiler_params=pltpu.CompilerParams(
            dimension_semantics=("parallel", "arbitrary"),
            vmem_limit_bytes=_vmem_limit(head_est)),
    )(flat, h1w, h1b2, gw, gb2)
    return out


# ----------------------------------------------------------------------------
# Pure-JAX reference (mirrors the PyTorch forward exactly)
# ----------------------------------------------------------------------------
def netrvlad_reference(x, params, *, batch, max_samples, feature_size,
                       cluster_size, output_dim):
    B, N, FEAT, CLUST = batch, max_samples, feature_size, cluster_size
    xn = x / jnp.maximum(jnp.linalg.norm(x, axis=1, keepdims=True), EPS)
    act = xn @ params["cluster_weights"] + params["cluster_biases"]
    act = jax.nn.softmax(act, axis=1)
    act = act.reshape(B, N, CLUST).transpose(0, 2, 1)          # [B, C, N]
    xr = xn.reshape(B, N, FEAT)
    vlad = act @ xr                                            # [B, C, F]
    vlad = vlad.transpose(0, 2, 1)                             # [B, F, C]
    vlad = vlad / jnp.maximum(jnp.linalg.norm(vlad, axis=1, keepdims=True), EPS)
    vlad = vlad.reshape(B, FEAT * CLUST)
    vlad = vlad / jnp.maximum(jnp.linalg.norm(vlad, axis=1, keepdims=True), EPS)
    hid = vlad @ params["hidden1_weights"] + params["hidden1_biases"]
    gates = jax.nn.sigmoid(hid @ params["gating_weights"] + params["gating_biases"])
    return hid * gates


if __name__ == "__main__":
    # small, module-consistent shapes
    BATCH = 2
    MAX_SAMPLES = 8
    FEATURE_SIZE = 32
    CLUSTER_SIZE = 16
    OUTPUT_DIM = 32

    key = jax.random.PRNGKey(0)
    k_x, k_cw, k_cb, k_h1w, k_gw, k_gb = jax.random.split(key, 6)

    # deterministic parameter init matching the module's __init__ statistics
    params = {
        "cluster_weights": jax.random.normal(k_cw, (FEATURE_SIZE, CLUSTER_SIZE),
                                             jnp.float32) / math.sqrt(FEATURE_SIZE),
        "cluster_biases": jax.random.normal(k_cb, (CLUSTER_SIZE,),
                                            jnp.float32) / math.sqrt(FEATURE_SIZE),
        "hidden1_weights": jax.random.normal(k_h1w,
                                             (CLUSTER_SIZE * FEATURE_SIZE, OUTPUT_DIM),
                                             jnp.float32) / math.sqrt(CLUSTER_SIZE),
        "hidden1_biases": jnp.full((OUTPUT_DIM,), 0.1, jnp.float32),
        "gating_weights": jax.random.normal(k_gw, (OUTPUT_DIM, OUTPUT_DIM),
                                            jnp.float32) / math.sqrt(OUTPUT_DIM),
        "gating_biases": jax.random.normal(k_gb, (OUTPUT_DIM,),
                                           jnp.float32) / math.sqrt(OUTPUT_DIM),
    }

    # input: already reshaped to [batch*max_samples, feature_size] as documented
    x = jax.random.normal(k_x, (BATCH * MAX_SAMPLES, FEATURE_SIZE), jnp.float32)

    cfg = dict(batch=BATCH, max_samples=MAX_SAMPLES, feature_size=FEATURE_SIZE,
               cluster_size=CLUSTER_SIZE, output_dim=OUTPUT_DIM)

    # f32 + exact reciprocal for the strict check; production configs should
    # pass bf16 x and mxu_dtype=jnp.bfloat16, approx_reciprocal=True (relaxed
    # tolerance) for full HBM/MXU throughput on v5e/v6e/v7x.
    out = netrvlad_forward(x, params, **cfg)
    out = jax.block_until_ready(out)

    ref = jax.block_until_ready(netrvlad_reference(x, params, **cfg))
    assert out.shape == (BATCH, OUTPUT_DIM)
    assert jnp.allclose(out, ref, rtol=1e-5, atol=1e-5), "mismatch vs reference"

    print("KERNEL_OK")
</pallas_src>

<mosaic_0001>
module attributes {stable_mosaic.version = 11 : i64} {
  func.func @_vlad_kernel(%arg0: i32, %arg1: memref<2x8x32xf32, #tpu.memory_space<vmem>>, %arg2: memref<32x16xf32, #tpu.memory_space<vmem>>, %arg3: memref<1x16xf32, #tpu.memory_space<vmem>>, %arg4: memref<2x16x32xf32, #tpu.memory_space<vmem>>) attributes {dimension_semantics = [#tpu.dimension_semantics<parallel>], iteration_bounds = array<i64: 1>, scalar_prefetch = 0 : i64, scratch_operands = 0 : i64, tpu.core_type = #tpu.core_type<tc>, window_params = [{transform_indices = @transform_0, window_bounds = array<i64: 2, 8, 32>}, {pipeline_mode = #tpu.pipeline_mode<synchronous>, transform_indices = @transform_1, window_bounds = array<i64: 32, 16>}, {pipeline_mode = #tpu.pipeline_mode<synchronous>, transform_indices = @transform_2, window_bounds = array<i64: 1, 16>}, {transform_indices = @transform_3, window_bounds = array<i64: 2, 16, 32>}]} {
    %c0 = arith.constant 0 : index
    %c0_0 = arith.constant 0 : index
    %c0_1 = arith.constant 0 : index
    %0 = vector.load %arg1[%c0, %c0_0, %c0_1] : memref<2x8x32xf32, #tpu.memory_space<vmem>>, vector<2x8x32xf32>
    %1 = vector.shape_cast %0 : vector<2x8x32xf32> to vector<16x32xf32>
    %2 = arith.mulf %1, %1 : vector<16x32xf32>
    %cst = arith.constant dense<0.000000e+00> : vector<16xf32>
    %3 = vector.multi_reduction <add>, %2, %cst [1] : vector<16x32xf32> to vector<16xf32>
    %4 = vector.shape_cast %3 : vector<16xf32> to vector<16x1xf32>
    %cst_2 = arith.constant 1.000000e-24 : f32
    %5 = vector.broadcast %cst_2 : f32 to vector<16x1xf32>
    %6 = arith.maximumf %4, %5 : vector<16x1xf32>
    %7 = math.rsqrt %6 : vector<16x1xf32>
    %8 = vector.broadcast %7 : vector<16x1xf32> to vector<16x32xf32>
    %9 = arith.mulf %1, %8 : vector<16x32xf32>
    %c0_3 = arith.constant 0 : index
    %c0_4 = arith.constant 0 : index
    %10 = vector.load %arg2[%c0_3, %c0_4] : memref<32x16xf32, #tpu.memory_space<vmem>>, vector<32x16xf32>
    %cst_5 = arith.constant dense<0.000000e+00> : vector<16x16xf32>
    %11 = tpu.matmul %9, %10, %cst_5 {dimension_numbers = #tpu.dot_dimension_numbers<[1], [0], [0], [1], [0, 0, 1, 1], [], []>} : vector<16x32xf32>, vector<32x16xf32>, vector<16x16xf32> -> vector<16x16xf32>
    %c0_6 = arith.constant 0 : index
    %c0_7 = arith.constant 0 : index
    %12 = vector.load %arg3[%c0_6, %c0_7] : memref<1x16xf32, #tpu.memory_space<vmem>>, vector<1x16xf32>
    %13 = vector.broadcast %12 : vector<1x16xf32> to vector<16x16xf32>
    %14 = arith.addf %11, %13 : vector<16x16xf32>
    %cst_8 = arith.constant dense<0xFF800000> : vector<16xf32>
    %15 = vector.multi_reduction <maximumf>, %14, %cst_8 [1] : vector<16x16xf32> to vector<16xf32>
    %16 = vector.shape_cast %15 : vector<16xf32> to vector<16x1xf32>
    %17 = vector.broadcast %16 : vector<16x1xf32> to vector<16x16xf32>
    %18 = arith.subf %14, %17 : vector<16x16xf32>
    %19 = math.exp %18 : vector<16x16xf32>
    %cst_9 = arith.constant dense<0.000000e+00> : vector<16xf32>
    %20 = vector.multi_reduction <add>, %19, %cst_9 [1] : vector<16x16xf32> to vector<16xf32>
    %21 = vector.shape_cast %20 : vector<16xf32> to vector<16x1xf32>
    %22 = tpu.reciprocal %21 : vector<16x1xf32> -> vector<16x1xf32>
    %23 = vector.broadcast %22 : vector<16x1xf32> to vector<16x16xf32>
    %24 = arith.mulf %19, %23 : vector<16x16xf32>
    %25 = vector.shape_cast %24 : vector<16x16xf32> to vector<2x8x16xf32>
    %26 = vector.shape_cast %9 : vector<16x32xf32> to vector<2x8x32xf32>
    %cst_10 = arith.constant dense<0.000000e+00> : vector<2x16x32xf32>
    %27 = tpu.matmul %25, %26, %cst_10 {dimension_numbers = #tpu.dot_dimension_numbers<[1], [1], [2], [2], [0, 0, 0, 2, 1, 2], [0], [0]>} : vector<2x8x16xf32>, vector<2x8x32xf32>, vector<2x16x32xf32> -> vector<2x16x32xf32>
    %28 = arith.mulf %27, %27 : vector<2x16x32xf32>
    %cst_11 = arith.constant dense<0.000000e+00> : vector<2x16xf32>
    %29 = vector.multi_reduction <add>, %28, %cst_11 [2] : vector<2x16x32xf32> to vector<2x16xf32>
    %30 = vector.shape_cast %29 : vector<2x16xf32> to vector<2x16x1xf32>
    %cst_12 = arith.constant 1.000000e-24 : f32
    %31 = vector.broadcast %cst_12 : f32 to vector<2x16x1xf32>
    %32 = arith.maximumf %30, %31 : vector<2x16x1xf32>
    %33 = math.rsqrt %32 : vector<2x16x1xf32>
    %34 = vector.broadcast %33 : vector<2x16x1xf32> to vector<2x16x32xf32>
    %35 = arith.mulf %27, %34 : vector<2x16x32xf32>
    %36 = arith.mulf %35, %35 : vector<2x16x32xf32>
    %cst_13 = arith.constant dense<0.000000e+00> : vector<2x16xf32>
    %37 = vector.multi_reduction <add>, %36, %cst_13 [2] : vector<2x16x32xf32> to vector<2x16xf32>
    %38 = vector.shape_cast %37 : vector<2x16xf32> to vector<2x16x1xf32>
    %cst_14 = arith.constant dense<0.000000e+00> : vector<2x1xf32>
    %39 = vector.multi_reduction <add>, %38, %cst_14 [1] : vector<2x16x1xf32> to vector<2x1xf32>
    %40 = vector.shape_cast %39 : vector<2x1xf32> to vector<2x1x1xf32>
    %cst_15 = arith.constant 1.000000e-24 : f32
    %41 = vector.broadcast %cst_15 : f32 to vector<2x1x1xf32>
    %42 = arith.maximumf %40, %41 : vector<2x1x1xf32>
    %43 = math.rsqrt %42 : vector<2x1x1xf32>
    %44 = vector.broadcast %43 : vector<2x1x1xf32> to vector<2x16x32xf32>
    %45 = arith.mulf %35, %44 : vector<2x16x32xf32>
    %c0_16 = arith.constant 0 : index
    %c0_17 = arith.constant 0 : index
    %c0_18 = arith.constant 0 : index
    %46 = vector.load %arg4[%c0_16, %c0_17, %c0_18] : memref<2x16x32xf32, #tpu.memory_space<vmem>>, vector<2x16x32xf32>
    tpu.vector_store %arg4[%c0_16, %c0_17, %c0_18], %45 {strides = array<i32>} : memref<2x16x32xf32, #tpu.memory_space<vmem>>, vector<2x16x32xf32>,
    return
  }
  func.func @transform_0(%arg0: i32) -> (i32, i32, i32) {
    %c0_i32 = arith.constant 0 : i32
    %c0_i32_0 = arith.constant 0 : i32
    %c0_i32_1 = arith.constant 0 : i32
    return %arg0, %c0_i32, %c0_i32_0 : i32, i32, i32
  }
  func.func @transform_1(%arg0: i32) -> (i32, i32) {
    %c0_i32 = arith.constant 0 : i32
    %c0_i32_0 = arith.constant 0 : i32
    %c0_i32_1 = arith.constant 0 : i32
    return %c0_i32, %c0_i32_0 : i32, i32
  }
  func.func @transform_2(%arg0: i32) -> (i32, i32) {
    %c0_i32 = arith.constant 0 : i32
    %c0_i32_0 = arith.constant 0 : i32
    %c0_i32_1 = arith.constant 0 : i32
    return %c0_i32, %c0_i32_0 : i32, i32
  }
  func.func @transform_3(%arg0: i32) -> (i32, i32, i32) {
    %c0_i32 = arith.constant 0 : i32
    %c0_i32_0 = arith.constant 0 : i32
    %c0_i32_1 = arith.constant 0 : i32
    return %arg0, %c0_i32, %c0_i32_0 : i32, i32, i32
  }
}

</mosaic_0001>

<bundles_post_ra>
// kernel: tpu_custom_call.1
= control target key start
LH: loop header
LB: loop body
LE: loop exit
PB: predicated region body
PF: predicated region fallthrough
CT: control target
= control target key end

     0   :  { %vm19_vm0 = vcmask 261120   ;;  %s617_s0 = inlined_call_operand.vmem [shape: f32[2,8,32], index: 0, kind: input, shape index: {}]   ;;  %s618_s1 = inlined_call_operand.vmem [shape: f32[32,16], index: 1, kind: input, shape index: {}]   ;;  %s619_s2 = inlined_call_operand.vmem [shape: f32[1,16], index: 2, kind: input, shape index: {}]   ;;  %s620_s3 = inlined_call_operand.hbm [shape: f32[2,16,32], index: 3, kind: output, shape index: {}]  }
   0x1   :  { %v15_v0 = vld [vmem:[%s617_s0] sm:$0xff]  ;;  %v16_v1 = vld [vmem:[%s617_s0 + $0x8] sm:$0xff] }
   0x2   :  { %8 = vsyncpa [#allocation3], 0  ;;  %v17_v2 = vmul.f32 %v15_v0, %v15_v0  ;;  %v18_v3 = vmul.f32 %v16_v1, %v16_v1  ;;  %v35_v6 = vld [vmem:[%s618_s1 + $0x18] sm:$0xff]  ;;  %v34_v7 = vld [vmem:[%s618_s1 + $0x10] sm:$0xff]  ;;  %vm124_vm1 = vcmask 130048   ;;  %vm179_vm2 = vcmask 64512  }
   0x3   :  { %479 = vmatprep.subr.mxu0 %v35_v6  ;;  %v33_v8 = vld [vmem:[%s618_s1 + $0x8] sm:$0xff]  ;;  %v32_v9 = vld [vmem:[%s618_s1] sm:$0xff] }
   0x4   :  { %v20_v4 = vsel %vm19_vm0, %v17_v2, 0.0  ;;  %v23_v5 = vsel %vm19_vm0, %v18_v3, 0.0  ;;  %480 = vmatpush3.msra.mxu0 %v35_v6  ;;  %v460_v19 = vld [vmem:[%s619_s2] ss:$0 sm:$0xff]  ;;  %s550_s2 = smov [#allocation2]  }
   0x5   :  { %21 = vadd.xlane.f32.xlu0 %v20_v4  ;;  %481 = vmatprep.subr.mxu0 %v34_v7  ;;  %s449_s24 = sshll.u32 %s550_s2, 4  ;;  %s450_s24 = int_to_ptr.vmem [resolvable:$true] %s449_s24 }
   0x6   :  { %482 = vmatpush3.msra.mxu0 %v34_v7  ;;  %s528_s25 = scalar_lea.vmem %s450_s24, 512  ;;  %p533_p1 = scmp.lt.s32.totalorder %s450_s24, %s450_s24 }
   0x7   :  { %483 = vmatprep.subr.mxu0 %v33_v8  ;;  %p529_p0 = scmp.ne.s32.totalorder %s450_s24, %s528_s25  ;;  %p534_p2 = scmp.lt.s32.totalorder %s528_s25, %s528_s25 }
   0x8   :  { %484 = vmatpush3.msra.mxu0 %v33_v8 }
   0x9   :  { %24 = vadd.xlane.f32.xlu0 %v23_v5  ;;  %485 = vmatprep.subr.mxu0 %v32_v9  ;;  %p535_p3 = por %p534_p2, %p533_p1 }
   0xa   :  { %486 = vmatpush3.msra.mxu0 %v32_v9 }
   0xb   :  { %p536_p4 = pnand %p535_p3, %p529_p0 }
  0x8e   :  { %v22_v10 = vpop.xlane.xlu0 %21 }
  0x8f   :  { %v26_v11 = vmax.f32 %v22_v10, 1e-24 }
  0x91   :  { %504 = vrsqrt.f32 %v26_v11 }
  0x92   :  { %v25_v12 = vpop.xlane.xlu0 %24 }
  0x93   :  { %v27_v13 = vmax.f32 %v25_v12, 1e-24 }
  0x95   :  { %506 = vrsqrt.f32 %v27_v13 }
  0x9e   :  { %v505_v14 = vpop.eup %504 }
  0x9f   :  { %v30_v15 = vmul.f32 %v505_v14, %v15_v0 }
  0xa1   :  { %487 = vmatprep.mubr.msk.f32.mxu0 %vm19_vm0, %v30_v15  ;;  %490 = vmatprep.subr.mxu1 %v30_v15 }
  0xa2   :  { %v507_v16 = vpop.eup %506  ;;  %491 = vmatpush3.msra.mxu1 %v30_v15 }
  0xa3   :  { %v31_v17 = vmul.f32 %v507_v16, %v16_v1 }
  0xa5   :  { %488 = vmatmul.mubr.msk.f32.vlgmr.msra.gmra.mxu0 %vm19_vm0, %v31_v17  ;;  %495 = vmatprep.subr.mxu1 %v31_v17 }
 0x165   :  { %v489_v18 = vpop.f32.mrf.mxu0 }
 0x166   :  { %v121_v22 = vadd.f32 %v489_v18, %v460_v19 }
 0x167   :  { %v115_v20 = vpop.f32.mrf.mxu0 }
 0x168   :  { %v116_v21 = vadd.f32 %v460_v19, %v115_v20  ;;  %v128_v24 = vsel %vm124_vm1, %v121_v22, -inf }
 0x16a   :  { %v125_v23 = vsel %vm124_vm1, %v116_v21, -inf }
 0x16b   :  { %126 = vmax.xlane.f32.xlu1 %v125_v23 }
 0x16f   :  { %129 = vmax.xlane.f32.xlu1 %v128_v24 }
 0x1f4   :  { %v127_v25 = vpop.xlane.xlu1 %126 }
 0x1f5   :  { %v131_v26 = vsub.f32 %v116_v21, %v127_v25 }
 0x1f7   :  { %v133_v27 = vmul.f32 1.442695, %v131_v26 }
 0x1f8   :  { %v130_v28 = vpop.xlane.xlu1 %129 }
 0x1f9   :  { %508 = vpow2.f32 %v133_v27  ;;  %v132_v29 = vsub.f32 %v121_v22, %v130_v28 }
 0x1fb   :  { %v135_v30 = vmul.f32 1.442695, %v132_v29 }
 0x1fd   :  { %510 = vpow2.f32 %v135_v30 }
 0x206   :  { %v509_v31 = vpop.eup %508 }
 0x207   :  { %v137_v32 = vsel %vm124_vm1, %v509_v31, 0.0 }
 0x208   :  { %138 = vadd.xlane.f32.xlu0 %v137_v32 }
 0x20a   :  { %v511_v33 = vpop.eup %510 }
 0x20b   :  { %v140_v34 = vsel %vm124_vm1, %v511_v33, 0.0 }
 0x20c   :  { %141 = vadd.xlane.f32.xlu1 %v140_v34 }
 0x291   :  { %v139_v35 = vpop.xlane.xlu0 %138 }
 0x292   :  { %512 = vrcp.f32 %v139_v35 }
 0x295   :  { %v142_v36 = vpop.xlane.xlu1 %141 }
 0x296   :  { %514 = vrcp.f32 %v142_v36 }
 0x29f   :  { %v513_v37 = vpop.eup %512 }
 0x2a0   :  { %v145_v38 = vmul.f32 %v513_v37, %v509_v31 }
 0x2a2   :  { %147 = vxpose.xlu0.b32.start.end [1/1] (short) (narrow) %v145_v38, 16 }
 0x2a3   :  { %v515_v39 = vpop.eup %514 }
 0x2a4   :  { %v146_v40 = vmul.f32 %v515_v39, %v511_v33 }
 0x2a6   :  { %261 = vxpose.xlu1.b32.start.end [1/1] (short) (narrow) %v146_v40, 16 }
 0x31e   :  { %v163_v41 = vpop.trf.xlu0 }
 0x31f   :  { %492 = vmatprep.mubr.msk.f32.mxu1 %vm179_vm2, %v163_v41 }
 0x322   :  { %v164_v42 = vpop.trf.xlu0  ;;  %v277_v43 = vpop.trf.xlu1 }
 0x323   :  { %493 = vmatmul.mubr.msk.f32.vlgmr.msra.gmra.mxu1 %vm179_vm2, %v164_v42 }
 0x324   :  { %496 = vmatpush3.msra.mxu1 %v31_v17  ;;  %497 = vmatprep.mubr.msk.f32.mxu1 %vm179_vm2, %v277_v43 }
 0x326   :  { %v278_v44 = vpop.trf.xlu1 }
 0x327   :  { %498 = vmatmul.mubr.msk.f32.vlgmr.msra.gmra.mxu1 %vm179_vm2, %v278_v44 }
 0x3e3   :  { %v494_v45 = vpop.f32.mrf.mxu1 }
 0x3e4   :  { %v375_v46 = vmul.f32 %v494_v45, %v494_v45 }
 0x3e5   :  { %v252_v47 = vpop.f32.mrf.mxu1 }
 0x3e6   :  { %v374_v48 = vmul.f32 %v252_v47, %v252_v47  ;;  %v381_v49 = vsel %vm19_vm0, %v375_v46, 0.0 }
 0x3e7   :  { %382 = vadd.xlane.f32.xlu1 %v381_v49  ;;  %v499_v50 = vpop.f32.mrf.mxu1 }
 0x3e8   :  { %v377_v51 = vmul.f32 %v499_v50, %v499_v50  ;;  %v378_v52 = vsel %vm19_vm0, %v374_v48, 0.0 }
 0x3e9   :  { %379 = vadd.xlane.f32.xlu0 %v378_v52  ;;  %v365_v53 = vpop.f32.mrf.mxu1 }
 0x3ea   :  { %v376_v54 = vmul.f32 %v365_v53, %v365_v53  ;;  %v387_v55 = vsel %vm19_vm0, %v377_v51, 0.0 }
 0x3eb   :  { %388 = vadd.xlane.f32.xlu1 %v387_v55 }
 0x3ec   :  { %v384_v56 = vsel %vm19_vm0, %v376_v54, 0.0 }
 0x3ed   :  { %385 = vadd.xlane.f32.xlu0 %v384_v56 }
 0x470   :  { %v383_v57 = vpop.xlane.xlu1 %382 }
 0x471   :  { %v391_v58 = vmax.f32 %v383_v57, 1e-24 }
 0x472   :  { %v380_v59 = vpop.xlane.xlu0 %379 }
 0x473   :  { %516 = vrsqrt.f32 %v391_v58  ;;  %v390_v60 = vmax.f32 %v380_v59, 1e-24 }
 0x474   :  { %v389_v61 = vpop.xlane.xlu1 %388 }
 0x475   :  { %518 = vrsqrt.f32 %v390_v60  ;;  %v393_v62 = vmax.f32 %v389_v61, 1e-24 }
 0x476   :  { %v386_v63 = vpop.xlane.xlu0 %385 }
 0x477   :  { %520 = vrsqrt.f32 %v393_v62  ;;  %v392_v0 = vmax.f32 %v386_v63, 1e-24 }
 0x479   :  { %522 = vrsqrt.f32 %v392_v0 }
 0x480   :  { %v517_v1 = vpop.eup %516 }
 0x481   :  { %v399_v2 = vmul.f32 %v517_v1, %v494_v45 }
 0x482   :  { %v519_v3 = vpop.eup %518 }
 0x483   :  { %v403_v4 = vmul.f32 %v399_v2, %v399_v2  ;;  %v398_v5 = vmul.f32 %v519_v3, %v252_v47 }
 0x484   :  { %v521_v6 = vpop.eup %520 }
 0x485   :  { %v409_v7 = vsel %vm19_vm0, %v403_v4, 0.0  ;;  %v402_v8 = vmul.f32 %v398_v5, %v398_v5  ;;  %v401_v9 = vmul.f32 %v521_v6, %v499_v50 }
 0x486   :  { %v523_v10 = vpop.eup %522  ;;  %410 = vadd.xlane.f32.xlu1 %v409_v7 }
 0x487   :  { %v406_v11 = vsel %vm19_vm0, %v402_v8, 0.0  ;;  %v405_v12 = vmul.f32 %v401_v9, %v401_v9  ;;  %v400_v13 = vmul.f32 %v523_v10, %v365_v53 }
 0x488   :  { %407 = vadd.xlane.f32.xlu0 %v406_v11 }
 0x489   :  { %v415_v14 = vsel %vm19_vm0, %v405_v12, 0.0  ;;  %v404_v15 = vmul.f32 %v400_v13, %v400_v13 }
 0x48a   :  { %416 = vadd.xlane.f32.xlu1 %v415_v14 }
 0x48b   :  { %v412_v16 = vsel %vm19_vm0, %v404_v15, 0.0 }
 0x48c   :  { %413 = vadd.xlane.f32.xlu0 %v412_v16 }
 0x50f   :  { %v411_v17 = vpop.xlane.xlu1 %410 }
 0x511   :  { %v408_v18 = vpop.xlane.xlu0 %407 }
 0x512   :  { %v418_v19 = vadd.f32 %v411_v17, %v408_v18 }
 0x513   :  { %v417_v21 = vpop.xlane.xlu1 %416 }
 0x514   :  { %v419_v20 = vrot.slane %v418_v19, 4 }
 0x515   :  { %v414_v22 = vpop.xlane.xlu0 %413 }
 0x516   :  { %v420_v23 = vadd.f32 %v419_v20, %v418_v19  ;;  %v425_v24 = vadd.f32 %v417_v21, %v414_v22 }
 0x518   :  { %v421_v25 = vrot.slane %v420_v23, 2  ;;  %v426_v26 = vrot.slane %v425_v24, 4 }
 0x51a   :  { %v422_v27 = vadd.f32 %v421_v25, %v420_v23  ;;  %v427_v28 = vadd.f32 %v426_v26, %v425_v24 }
 0x51c   :  { %v423_v29 = vrot.slane %v422_v27, 1  ;;  %v428_v30 = vrot.slane %v427_v28, 2 }
 0x51e   :  { %v424_v31 = vadd.f32 %v423_v29, %v422_v27  ;;  %v429_v32 = vadd.f32 %v428_v30, %v427_v28 }
 0x520   :  { %v432_v33 = vmax.f32 %v424_v31, 1e-24  ;;  %v430_v34 = vrot.slane %v429_v32, 1 }
 0x522   :  { %524 = vrsqrt.f32 %v432_v33  ;;  %v431_v35 = vadd.f32 %v430_v34, %v429_v32 }
 0x524   :  { %v433_v36 = vmax.f32 %v431_v35, 1e-24 }
 0x526   :  { %526 = vrsqrt.f32 %v433_v36 }
 0x52f   :  { %v525_v37 = vpop.eup %524 }
 0x530   :  { %v436_v38 = vmul.f32 %v525_v37, %v398_v5  ;;  %v437_v39 = vmul.f32 %v525_v37, %v399_v2 }
 0x532   :  { %440 = vst.msk [vmem:[#allocation2] sm:$0xff] %vm19_vm0, %v436_v38  ;;  %441 = vst.msk [vmem:[#allocation2 + $0x8] sm:$0xff] %vm19_vm0, %v437_v39 }
 0x533   :  { %v527_v40 = vpop.eup %526 }
 0x534   :  { %v438_v41 = vmul.f32 %v527_v40, %v400_v13  ;;  %v439_v42 = vmul.f32 %v527_v40, %v401_v9 }
 0x536   :  { %442 = vst.msk [vmem:[#allocation2 + $0x10] sm:$0xff] %vm19_vm0, %v438_v41  ;;  %443 = vst.msk [vmem:[#allocation2 + $0x18] sm:$0xff] %vm19_vm0, %v439_v42 }
 0x537   :  { %539 = shalt.err (!%p536_p4)
}
 0x538   :  { %s551_s26 = smov 128   ;;  %s552_s27 = smov 8  }
 0x539   :  { %455 = dma.vmem_to_hbm [thread:$0]  %s450_s24, 512, %s620_s3, [#allocation3], %s551_s26, %s551_s26, %s552_s27  }
 0x53a   :  { %548 = dma.done.wait [#allocation3], 512  }
 0x53b   :  { %549 = vsyncadd [#allocation3], 4294966784 }
 0x53c   :  { %459 = vsyncpa [#allocation3], 1 }

</bundles_post_ra>
